<compile_context>
chip_gen: v7x
topology: tpu7x:2x2x1
jax: 0.10.0
libtpu: 0.0.40
codegen_flags: <defaults>
</compile_context>

<pallas_src>
import jax
import jax.numpy as jnp
from jax.experimental import pallas as pl
from jax.experimental.pallas import tpu as pltpu


def _entropy_kernel(x_ref, o_ref):
    # x_ref block: (1, C, S_tile, 128) ; o_ref block: (1, S_tile, 128)
    x = x_ref[...]
    if x.dtype != jnp.float32:
        x = x.astype(jnp.float32)
    # Numerically stable: reductions over C (leading dim -> elementwise across vregs).
    m = jnp.max(x, axis=1, keepdims=True)            # (1, 1, S_tile, 128)
    shifted = x - m                                  # (1, C, S_tile, 128)
    e = jnp.exp(shifted)                             # (1, C, S_tile, 128)
    denom = jnp.sum(e, axis=1)                       # (1, S_tile, 128)
    num = jnp.sum(e * shifted, axis=1)               # (1, S_tile, 128)
    # entropy = log(denom) - sum_c(e * shifted) / denom   (per-pixel only)
    ent = jnp.log(denom) - num * pl.reciprocal(denom, approx=False)
    o_ref[...] = ent.astype(o_ref.dtype)


def _choose_s_tile(S, C):
    """Pick a sublane-tile (rows of 128 lanes) so the per-step input block stays
    ~<= 4 MiB f32 (<= 8 MiB double-buffered), safe on v5e/v6e/v7x defaults."""
    max_bytes = 4 * 1024 * 1024
    max_rows = max(8, max_bytes // (C * 128 * 4))
    max_rows = (max_rows // 8) * 8                   # multiple of 8 (sublane rule)
    if S <= max_rows:
        return S                                     # one block covers full S
    return max_rows


def entropy_each(x):
    """x: [B, C, H, W] (NCHW). Returns per-pixel entropy over channels: [B, H, W]."""
    B, C, H, W = x.shape
    HW = H * W

    # Flatten spatial dims and pad to a multiple of 128 lanes.
    x3 = x.reshape(B, C, HW)
    HW_pad = ((HW + 127) // 128) * 128
    if HW_pad != HW:
        x3 = jnp.pad(x3, ((0, 0), (0, 0), (0, HW_pad - HW)))
    S = HW_pad // 128
    x4 = x3.reshape(B, C, S, 128)

    # Tile the spatial-row axis; pad S so it divides evenly into S_tile blocks.
    S_tile = _choose_s_tile(S, C)
    if S % S_tile != 0:
        S_pad = ((S + S_tile - 1) // S_tile) * S_tile
        x4 = jnp.pad(x4, ((0, 0), (0, 0), (0, S_pad - S), (0, 0)))
    else:
        S_pad = S

    grid = (B, S_pad // S_tile)

    out = pl.pallas_call(
        _entropy_kernel,
        out_shape=jax.ShapeDtypeStruct((B, S_pad, 128), jnp.float32),
        grid_spec=pltpu.PrefetchScalarGridSpec(
            num_scalar_prefetch=0,
            grid=grid,
            in_specs=[pl.BlockSpec((1, C, S_tile, 128), lambda b, s: (b, 0, s, 0))],
            out_specs=pl.BlockSpec((1, S_tile, 128), lambda b, s: (b, s, 0)),
        ),
        compiler_params=pltpu.CompilerParams(
            dimension_semantics=("parallel", "parallel"),
        ),
    )(x4)

    # Drop padded pixels and restore [B, H, W].
    return out.reshape(B, S_pad * 128)[:, :HW].reshape(B, H, W)


def entropy_each_ref(x):
    """Pure-JAX reference matching the PyTorch module."""
    sm = jax.nn.softmax(x, axis=1)
    lsm = jax.nn.log_softmax(x, axis=1)
    return -1.0 * jnp.sum(sm * lsm, axis=1)


if __name__ == "__main__":
    key = jax.random.PRNGKey(0)
    B, C, H, W = 2, 4, 16, 16
    x = jax.random.normal(key, (B, C, H, W), dtype=jnp.float32)

    out = entropy_each(x)
    out = jax.block_until_ready(out)

    ref = entropy_each_ref(x)
    assert out.shape == (B, H, W), out.shape
    assert jnp.allclose(out, ref, atol=1e-5, rtol=1e-5), (
        float(jnp.max(jnp.abs(out - ref)))
    )
    print("KERNEL_OK")
</pallas_src>

<mosaic_0001>
module attributes {stable_mosaic.version = 11 : i64} {
  func.func @_entropy_kernel(%arg0: i32, %arg1: i32, %arg2: memref<1x4x2x128xf32, #tpu.memory_space<vmem>>, %arg3: memref<1x2x128xf32, #tpu.memory_space<vmem>>) attributes {dimension_semantics = [#tpu.dimension_semantics<parallel>, #tpu.dimension_semantics<parallel>], iteration_bounds = array<i64: 2, 1>, scalar_prefetch = 0 : i64, scratch_operands = 0 : i64, tpu.core_type = #tpu.core_type<tc>, window_params = [{transform_indices = @transform_0, window_bounds = array<i64: 1, 4, 2, 128>}, {transform_indices = @transform_1, window_bounds = array<i64: 1, 2, 128>}]} {
    %c0 = arith.constant 0 : index
    %c0_0 = arith.constant 0 : index
    %c0_1 = arith.constant 0 : index
    %c0_2 = arith.constant 0 : index
    %0 = vector.load %arg2[%c0, %c0_0, %c0_1, %c0_2] : memref<1x4x2x128xf32, #tpu.memory_space<vmem>>, vector<1x4x2x128xf32>
    %cst = arith.constant dense<0xFF800000> : vector<1x2x128xf32>
    %1 = vector.multi_reduction <maximumf>, %0, %cst [1] : vector<1x4x2x128xf32> to vector<1x2x128xf32>
    %2 = vector.shape_cast %1 : vector<1x2x128xf32> to vector<1x1x2x128xf32>
    %3 = vector.broadcast %2 : vector<1x1x2x128xf32> to vector<1x4x2x128xf32>
    %4 = arith.subf %0, %3 : vector<1x4x2x128xf32>
    %5 = math.exp %4 : vector<1x4x2x128xf32>
    %cst_3 = arith.constant dense<0.000000e+00> : vector<1x2x128xf32>
    %6 = vector.multi_reduction <add>, %5, %cst_3 [1] : vector<1x4x2x128xf32> to vector<1x2x128xf32>
    %7 = arith.mulf %5, %4 : vector<1x4x2x128xf32>
    %cst_4 = arith.constant dense<0.000000e+00> : vector<1x2x128xf32>
    %8 = vector.multi_reduction <add>, %7, %cst_4 [1] : vector<1x4x2x128xf32> to vector<1x2x128xf32>
    %9 = math.log %6 : vector<1x2x128xf32>
    %10 = tpu.reciprocal %6 : vector<1x2x128xf32> -> vector<1x2x128xf32>
    %11 = arith.mulf %8, %10 : vector<1x2x128xf32>
    %12 = arith.subf %9, %11 : vector<1x2x128xf32>
    %c0_5 = arith.constant 0 : index
    %c0_6 = arith.constant 0 : index
    %c0_7 = arith.constant 0 : index
    %13 = vector.load %arg3[%c0_5, %c0_6, %c0_7] : memref<1x2x128xf32, #tpu.memory_space<vmem>>, vector<1x2x128xf32>
    tpu.vector_store %arg3[%c0_5, %c0_6, %c0_7], %12 {strides = array<i32>} : memref<1x2x128xf32, #tpu.memory_space<vmem>>, vector<1x2x128xf32>,
    return
  }
  func.func @transform_0(%arg0: i32, %arg1: i32) -> (i32, i32, i32, i32) {
    %c0_i32 = arith.constant 0 : i32
    %c0_i32_0 = arith.constant 0 : i32
    %c0_i32_1 = arith.constant 0 : i32
    return %arg0, %c0_i32, %arg1, %c0_i32_0 : i32, i32, i32, i32
  }
  func.func @transform_1(%arg0: i32, %arg1: i32) -> (i32, i32, i32) {
    %c0_i32 = arith.constant 0 : i32
    %c0_i32_0 = arith.constant 0 : i32
    return %arg0, %arg1, %c0_i32 : i32, i32, i32
  }
}

</mosaic_0001>

<bundles_post_ra>
// kernel: tpu_custom_call.1
= control target key start
LH: loop header
LB: loop body
LE: loop exit
PB: predicated region body
PF: predicated region fallthrough
CT: control target
= control target key end

     0   :  { %6 = vsyncpa [#allocation3], 0  ;;  %s701_s0 = inlined_call_operand.hbm [shape: f32[2,4,2,128], index: 0, kind: input, shape index: {}]   ;;  %s702_s1 = inlined_call_operand.hbm [shape: f32[2,2,128], index: 1, kind: output, shape index: {}]  }
   0x1   :  { %8 = vsyncpa [#allocation3 + $0x1], 0 }
   0x2   :  { %9 = vsyncpa [#allocation4], 0 }
   0x3   :  { %11 = vsyncpa [#allocation4 + $0x1], 0  ;;  %s515_s6 = smov 0   ;;  %s517_s7 = smov 0  }
   0x4   :  { %s519_s8 = smov 0   ;;  %s521_s9 = smov 0  }
   0x5   :  { %s523_s10 = smov 0   ;;  %s525_s11 = smov 0  }
   0x6 LB: > { %s296_s12 = sadd.s32 4294967295, %s499_s11   ;;  %s297_s13 = sadd.s32 4294967294, %s499_s11   ;;  %s499_s11 = sphi %s525_s11, %s17_s11   ;;  %s495_s10 = sphi %s523_s10, %s717_s10   ;;  %s491_s9 = sphi %s521_s9, %s716_s9   ;;  %s487_s8 = sphi %s519_s8, %s715_s8   ;;  %s483_s7 = sphi %s517_s7, %s714_s7   ;;  %s479_s6 = sphi %s515_s6, %s713_s6  }
   0x7   : > { %s29_s14 = sadd.s32 1, %s495_s10  ;;  %s38_s15 = sadd.s32 1, %s487_s8 }
   0x8   : > { %p31_p0 = scmp.ge.s32.totalorder %s29_s14, 2  ;;  %p45_p1 = scmp.ne.s32.totalorder %s487_s8, %s483_s7 }
   0x9   : > { %p46_p2 = scmp.eq.s32.totalorder %s499_s11, 0  ;;  %p51_p3 = scmp.ne.s32.totalorder %s483_s7, %s479_s6 }
   0xa   : > { %s719_s14 = smov (%p31_p0, %s29_s14), 0  ;;  %p52_p5 = scmp.eq.s32.totalorder %s296_s12, 0 }
   0xb   : > { %p556_p4 = por %p46_p2, %p45_p1  ;;  %s33_s17 = ssub.s32 %s495_s10, %s719_s14 }
   0xc   : > { %p77_p6 = scmp.eq.s32.totalorder %s296_s12, 1  ;;  %p36_p7 = scmp.eq.s32.totalorder %s33_s17, 0 }
   0xd   : > { %p562_p8 = por %p52_p5, %p51_p3  ;;  %p83_p10 = scmp.eq.s32.totalorder %s297_s13, 1 }
   0xe   : > { %p566_p9 = por %p77_p6, %p45_p1  ;;  %p323_p13 = scmp.lt.s32.totalorder %s499_s11, 2 }
   0xf   : > { %s571_s20 = scalar_select %p36_p7, %s487_s8, %s38_s15  }
  0x10   : > { %s706_s19 = scalar_select %p566_p9, 1, 0 }
  0x11   : > { %p573_p11 = por %p83_p10, %p51_p3  ;;  %s103_s22 = sand.u32 1, %s487_s8  }
  0x12   : > { %s300_s23 = sshll.u32 %s103_s22, 3  ;;  %s310_s24 = sshll.u32 %s495_s10, 7 }
  0x13   : > { %s707_s21 = scalar_select %p573_p11, 1, 0 }
  0x14   : > { %s584_s27 = scalar_lea.hbm %s701_s0, %s310_s24  ;;  %s107_s28 = scalar_lea.vmem [#allocation2], %s300_s23 }
  0x15   : > { %s115_s29 = sshll.u32 %s107_s28, 4  ;;  %p590_p0 = pnand %p323_p13, %p556_p4  ;;  %s586_s29 = int_to_ptr.vmem [resolvable:$true] %s115_s29 }
  0x16   : > { %s595_s2 = scalar_lea.sflag [#allocation3], %s103_s22  ;;  %s387_s3 = scalar_lea.hbm %s584_s27, 128 }
  0x17   : > { %p388_p2 = scmp.ne.s32.totalorder %s584_s27, %s387_s3  ;;  %p389_p3 = pneg %p590_p0 }
  0x18   : > { %s392_s12 = scalar_lea.hbm %s701_s0, 256  ;;  %p393_p4 = scmp.lt.u32.totalorder %s584_s27, %s701_s0 }
  0x19   : > { %p390_p5 = pnand %p389_p3, %p388_p2  ;;  %p394_p7 = scmp.lt.u32.totalorder %s392_s12, %s387_s3 }
  0x1a   : > { %p396_p13 = scmp.lt.u32.totalorder %s387_s3, %s584_s27 }
  0x1b   : > { %p391_p6 = pneg %p390_p5  ;;  %p395_p10 = por %p394_p7, %p393_p4 }
  0x1d   : > { %p397_p12 = por %p396_p13, %p395_p10 }
  0x1f   : > { %p398_p1 = pnand %p397_p12, %p391_p6 }
  0x21   : > { %401 = shalt.err (!%p398_p1)
}
  0x22   : > { %s402_s16 = scalar_lea.vmem %s586_s29, 128  ;;  %s501_s17 = smov [#allocation2]  }
  0x23   : > { %p403_p2 = scmp.ne.s32.totalorder %s586_s29, %s402_s16  ;;  %s407_s22 = sshll.u32 %s501_s17, 4  ;;  %s408_s22 = int_to_ptr.vmem [resolvable:$false] %s407_s22 }
  0x24   : > { %s409_s23 = scalar_lea.vmem %s408_s22, 256  ;;  %p410_p9 = scmp.lt.s32.totalorder %s586_s29, %s408_s22 }
  0x25   : > { %p405_p5 = pnand %p403_p2, %p389_p3  ;;  %p411_p4 = scmp.lt.s32.totalorder %s409_s23, %s402_s16 }
  0x27   : > { %p406_p11 = pneg %p405_p5  ;;  %p412_p7 = por %p411_p4, %p410_p9 }
  0x29   : > { %p413_p10 = pnand %p412_p7, %p406_p11 }
  0x2b   : > { %416 = shalt.err (!%p413_p10)
}
  0x2c   : > { %s502_s24 = smov 32   ;;  %s503_s25 = smov 2  }
  0x2d   : > { %318 = dma.hbm_to_vmem [thread:$0]  (!%p590_p0), %s584_s27, 128, %s586_s29, %s595_s2, %s502_s24, %s502_s24, %s503_s25  }
  0x2e   : > { %p123_p12 = scmp.lt.s32.totalorder %s499_s11, 3  ;;  %p709_p1 = scmp.ge.s32.totalorder %s499_s11, 1 }
  0x30   : > { %p124_p3 = pnand %p709_p1, %p123_p12 }
  0x31   : > { %s627_s26 = sand.u32 (!%p124_p3), 1, %s483_s7  }
  0x32   : > { %127 = sbr.rel (%p124_p3) target bundleno = 118 (0x76), region = 24  ;;  %s304_s28 = sshll.u32 (!%p124_p3), %s627_s26, 3 }
  0x33   : > { %s130_s3 = scalar_lea.sflag (!%p124_p3), [#allocation3], %s627_s26  ;;  %s133_s4 = scalar_lea.vmem (!%p124_p3), [#allocation2], %s304_s28 }
  0x39   : > { %470 = dma.done.wait (%p562_p8), %s130_s3, 128  }
  0x3a   : > { %472 = vsyncadd (%p562_p8), %s130_s3, 4294967168  ;;  %vm156_vm0 = vcmask 1041408   ;;  %v152_v0 = vld [vmem:[%s133_s4] sm:$0x3]  ;;  %v153_v1 = vld [vmem:[%s133_s4 + $0x2] sm:$0x3] }
  0x3b   : > { %v154_v2 = vld [vmem:[%s133_s4 + $0x4] sm:$0x3]  ;;  %v155_v3 = vld [vmem:[%s133_s4 + $0x6] sm:$0x3]  ;;  %v157_v4 = vsel %vm156_vm0, %v152_v0, -inf  ;;  %v158_v5 = vsel %vm156_vm0, %v153_v1, -inf }
  0x3c   : > { %v159_v6 = vsel %vm156_vm0, %v154_v2, -inf  ;;  %v160_v7 = vsel %vm156_vm0, %v155_v3, -inf  ;;  %v161_v8 = vmax.f32 %v157_v4, %v158_v5  ;;  %s305_s18 = sshll.u32 %s627_s26, 1  ;;  %s307_s30 = sshll.u32 %s491_s9, 5 }
  0x3d   : > { %v162_v9 = vmax.f32 %v159_v6, %v160_v7  ;;  %s151_s27 = scalar_lea.vmem [#allocation5], %s305_s18  ;;  %s654_s12 = scalar_lea.hbm %s702_s1, %s307_s30 }
  0x3e   : > { %s215_s29 = sshll.u32 %s151_s27, 4  ;;  %s201_s13 = scalar_lea.sflag [#allocation4], %s627_s26  ;;  %s649_s29 = int_to_ptr.vmem [resolvable:$true] %s215_s29 }
  0x3f   : > { %v163_v10 = vmax.f32 %v161_v8, %v162_v9  ;;  %s417_s15 = scalar_lea.vmem %s649_s29, 32  ;;  %p710_p9 = scmp.ne.s32.totalorder %s706_s19, 0 }
  0x40   : > { %p418_p8 = scmp.ne.s32.totalorder %s649_s29, %s417_s15  ;;  %s504_s9 = smov [#allocation5]  }
  0x41   : > { %v164_v11 = vsub.f32 %v152_v0, %v163_v10  ;;  %v165_v12 = vsub.f32 %v153_v1, %v163_v10  ;;  %v166_v13 = vsub.f32 %v154_v2, %v163_v10  ;;  %v167_v14 = vsub.f32 %v155_v3, %v163_v10  ;;  %s421_s16 = sshll.u32 %s504_s9, 4  ;;  %s422_s16 = int_to_ptr.vmem [resolvable:$false] %s421_s16 }
  0x42   : > { %p419_p11 = pnand %p418_p8, %p710_p9  ;;  %s423_s17 = scalar_lea.vmem %s422_s16, 64 }
  0x43   : > { %v168_v15 = vmul.f32 1.442695, %v164_v11  ;;  %v170_v16 = vmul.f32 1.442695, %v165_v12  ;;  %v172_v17 = vmul.f32 1.442695, %v166_v13  ;;  %p424_p6 = scmp.lt.s32.totalorder %s649_s29, %s422_s16  ;;  %p425_p13 = scmp.lt.s32.totalorder %s423_s17, %s417_s15 }
  0x44   : > { %v174_v18 = vmul.f32 1.442695, %v167_v14  ;;  %p420_p0 = pneg %p419_p11 }
  0x45   : > { %375 = vpow2.f32 %v168_v15  ;;  %p426_p2 = por %p425_p13, %p424_p6 }
  0x46   : > { %377 = vpow2.f32 %v170_v16 }
  0x47   : > { %379 = vpow2.f32 %v172_v17  ;;  %p427_p5 = pnand %p426_p2, %p420_p0 }
  0x48   : > { %381 = vpow2.f32 %v174_v18 }
  0x4f   : > { %v376_v19 = vpop.eup %375 }
  0x50   : > { %v378_v20 = vpop.eup %377  ;;  %v176_v21 = vsel %vm156_vm0, %v376_v19, 0.0  ;;  %v183_v24 = vmul.f32 %v376_v19, %v164_v11 }
  0x51   : > { %v380_v22 = vpop.eup %379  ;;  %v177_v23 = vsel %vm156_vm0, %v378_v20, 0.0  ;;  %v184_v25 = vmul.f32 %v378_v20, %v165_v12 }
  0x52   : > { %v382_v26 = vpop.eup %381  ;;  %v178_v27 = vadd.f32 %v177_v23, %v176_v21  ;;  %v179_v28 = vsel %vm156_vm0, %v380_v22, 0.0  ;;  %v185_v31 = vmul.f32 %v380_v22, %v166_v13  ;;  %v187_v32 = vsel %vm156_vm0, %v183_v24, 0.0 }
  0x53   : > { %v181_v29 = vsel %vm156_vm0, %v382_v26, 0.0  ;;  %v188_v33 = vsel %vm156_vm0, %v184_v25, 0.0  ;;  %v186_v36 = vmul.f32 %v382_v26, %v167_v14 }
  0x54   : > { %v180_v30 = vadd.f32 %v179_v28, %v178_v27  ;;  %v189_v35 = vadd.f32 %v188_v33, %v187_v32  ;;  %v190_v37 = vsel %vm156_vm0, %v185_v31, 0.0 }
  0x55   : > { %v192_v39 = vsel %vm156_vm0, %v186_v36, 0.0 }
  0x56   : > { %v182_v34 = vadd.f32 %v181_v29, %v180_v30  ;;  %v191_v38 = vadd.f32 %v190_v37, %v189_v35 }
  0x58   : > { %383 = vlog2.f32 %v182_v34  ;;  %v193_v40 = vadd.f32 %v192_v39, %v191_v38 }
  0x59   : > { %385 = vrcp.f32 %v182_v34 }
  0x62   : > { %v384_v41 = vpop.eup %383 }
  0x63   : > { %v386_v42 = vpop.eup %385  ;;  %v195_v43 = vmul.f32 0.6931472, %v384_v41 }
  0x64   : > { %v197_v44 = vmul.f32 %v386_v42, %v193_v40 }
  0x66   : > { %v198_v45 = vsub.f32 %v195_v43, %v197_v44 }
  0x68   : > { %199 = vst [vmem:[%s151_s27] sm:$0x3] %v198_v45 }
  0x69   : > { %430 = shalt.err (!%p427_p5)
}
  0x6a   : > { %s431_s22 = scalar_lea.hbm %s654_s12, 32  ;;  %s435_s25 = scalar_lea.hbm %s702_s1, 64 }
  0x6b   : > { %p432_p4 = scmp.ne.s32.totalorder %s654_s12, %s431_s22  ;;  %p436_p12 = scmp.lt.u32.totalorder %s654_s12, %s702_s1 }
  0x6c   : > { %p437_p1 = scmp.lt.u32.totalorder %s435_s25, %s431_s22  ;;  %p439_p8 = scmp.lt.u32.totalorder %s431_s22, %s654_s12 }
  0x6d   : > { %p433_p7 = pnand %p432_p4, %p710_p9 }
  0x6e   : > { %p438_p3 = por %p437_p1, %p436_p12 }
  0x6f   : > { %p434_p10 = pneg %p433_p7 }
  0x70   : > { %p440_p11 = por %p439_p8, %p438_p3 }
  0x72   : > { %p441_p0 = pnand %p440_p11, %p434_p10 }
  0x74   : > { %444 = shalt.err (!%p441_p0)
}
  0x75   : > { %313 = dma.vmem_to_hbm [thread:$0]  (%p710_p9), %s649_s29, 32, %s654_s12, %s201_s13  }
  0x76 PF: > { %s227_s3 = sand.u32 1, %s479_s6   ;;  %p711_p6 = scmp.ne.s32.totalorder %s707_s21, 0 }
  0x77   : > { %p712_p13 = scmp.ge.s32.totalorder %s499_s11, 2  ;;  %s228_s4 = scalar_lea.sflag [#allocation4], %s227_s3 }
  0x79   : > { %p320_p2 = pnand %p712_p13, %p711_p6 }
  0x7b   : > { %474 = dma.done.wait (!%p320_p2), %s228_s4, 32  }
  0x7c   : > { %476 = vsyncadd (!%p320_p2), %s228_s4, 4294967264  ;;  %s17_s11 = sadd.s32 1, %s499_s11   ;;  %s713_s6 = smov %s483_s7 }
  0x7d   : > { %p14_p5 = scmp.ge.s32.totalorder %s17_s11, 4   ;;  %s714_s7 = smov %s487_s8 }
  0x7e   : > { %s715_s8 = smov %s571_s20  ;;  %s716_s9 = smov %s495_s10 }
  0x7f   : > { %s717_s10 = smov %s719_s14  ;;  %16 = sbr.rel (!%p14_p5) target bundleno = 6 (0x6), region = 69 }
  0x86   :  { %233 = vsyncpa [#allocation3], 1 }
  0x87   :  { %235 = vsyncpa [#allocation3 + $0x1], 1 }
  0x88   :  { %236 = vsyncpa [#allocation4], 1 }
  0x89   :  { %238 = vsyncpa [#allocation4 + $0x1], 1 }

</bundles_post_ra>
